<compile_context>
chip_gen: v7x
topology: tpu7x:2x2x1
jax: 0.10.0
libtpu: 0.0.40
codegen_flags: <defaults>
</compile_context>

<pallas_src>
import jax
import jax.numpy as jnp
from jax.experimental import pallas as pl
from jax.experimental.pallas import tpu as pltpu

MARGIN = 0.5
EPS = 1e-6  # torch.nn.PairwiseDistance default eps (added to the difference)

_TARGET_BLOCK_BYTES = 4 * 1024 * 1024   # ~4 MiB per input block
_MAX_TILE_ROWS = 4096                   # bounds lane-padded (tile_b, 1) buffers
_VMEM_LIMIT_BYTES = 40 * 1024 * 1024    # explicit scoped-VMEM budget (all gens)


def _contrastive_kernel(out0_ref, out1_ref, label_ref, loss_ref):
    # Elementwise diff + eps (matches torch PairwiseDistance semantics).
    diff = out0_ref[...].astype(jnp.float32) - out1_ref[...].astype(jnp.float32) + EPS
    # Row-wise squared L2 norm, keep lane dim -> (tile_b, 1)
    d2 = jnp.sum(diff * diff, axis=-1, keepdims=True)
    d = jnp.sqrt(d2)
    gt = label_ref[...]  # (tile_b, 1), already float32
    # Keep d*d (not d2) to mirror torch's pow(dist, 2) after the sqrt.
    pos = gt * 0.5 * (d * d)
    neg = (1.0 - gt) * 0.5 * jnp.square(jnp.maximum(MARGIN - d, 0.0))
    loss_ref[...] = pos + neg


def _round_up(x, m):
    return ((x + m - 1) // m) * m


def _sublane_pack(dtype):
    # 8 for 4-byte dtypes, 16 for 2-byte (bf16), 32 for 1-byte (int8/fp8).
    return max(8, 32 // jnp.dtype(dtype).itemsize)


def _choose_tile_b(B, D, dtype):
    """Rows per input block: ~4 MiB target, dtype-sublane-packed, >=2 tiles
    when the batch allows it (v7x megacore), capped to bound (tile_b, 1)
    lane-padding waste."""
    pack = _sublane_pack(dtype)
    itemsize = jnp.dtype(dtype).itemsize
    b_ceil = _round_up(B, pack)

    rows = _TARGET_BLOCK_BYTES // max(1, D * itemsize)
    rows = min(rows, _MAX_TILE_ROWS)
    # Ensure at least two grid steps when possible so both v7x TensorCores get
    # work; neutral on v5e/v6e (one extra ~0.35us step at most).
    if b_ceil > pack:
        rows = min(rows, _round_up(b_ceil // 2, pack))
    rows = max(pack, (rows // pack) * pack)
    return min(rows, b_ceil)


@jax.jit
def contrastive_loss(out0, out1, label):
    """out0, out1: (B, D) arrays; label: (B,) array (any numeric dtype).

    Returns (B,) float32 per-sample contrastive loss (no reduction),
    matching ContrastiveLoss.forward in PyTorch.
    """
    B, D = out0.shape
    tile_b = _choose_tile_b(B, D, out0.dtype)
    n_tiles = (B + tile_b - 1) // tile_b
    b_pad = n_tiles * tile_b

    # Only the tiny label (and the tiny output) cover the padded extent; the
    # big (B, D) inputs are passed through untouched — the last block's
    # overrun rows are junk that gets sliced off below.
    label2d = label.astype(jnp.float32).reshape(B, 1)
    if b_pad != B:
        label2d = jnp.pad(label2d, ((0, b_pad - B), (0, 0)))

    loss2d = pl.pallas_call(
        _contrastive_kernel,
        out_shape=jax.ShapeDtypeStruct((b_pad, 1), jnp.float32),
        grid=(n_tiles,),
        in_specs=[
            pl.BlockSpec((tile_b, D), lambda i: (i, 0)),
            pl.BlockSpec((tile_b, D), lambda i: (i, 0)),
            pl.BlockSpec((tile_b, 1), lambda i: (i, 0)),
        ],
        out_specs=pl.BlockSpec((tile_b, 1), lambda i: (i, 0)),
        compiler_params=pltpu.CompilerParams(
            dimension_semantics=("parallel",),
            vmem_limit_bytes=_VMEM_LIMIT_BYTES,
        ),
    )(out0, out1, label2d)

    # .squeeze() in the torch module -> (B,); drop any overrun/padded rows.
    return loss2d.reshape(b_pad)[:B]


def _reference(out0, out1, label):
    # Pure-JAX reference mirroring the PyTorch forward exactly.
    gt = label.astype(jnp.float32)
    d = jnp.sqrt(
        jnp.sum(
            jnp.square(out0.astype(jnp.float32) - out1.astype(jnp.float32) + EPS),
            axis=-1,
        )
    )
    return gt * 0.5 * d * d + (1.0 - gt) * 0.5 * jnp.square(
        jnp.clip(MARGIN - d, 0.0, None)
    )


if __name__ == "__main__":
    key = jax.random.PRNGKey(0)
    k0, k1, k2, k3, k4, k5 = jax.random.split(key, 6)

    # Small embedding batch consistent with the module's usage.
    B, D = 8, 32
    out0 = jax.random.normal(k0, (B, D), dtype=jnp.float32)
    out1 = jax.random.normal(k1, (B, D), dtype=jnp.float32)
    label = jax.random.bernoulli(k2, 0.5, (B,)).astype(jnp.int32)

    loss = contrastive_loss(out0, out1, label)
    jax.block_until_ready(loss)
    ref = _reference(out0, out1, label)
    assert loss.shape == (B,)
    assert jnp.allclose(loss, ref, atol=1e-5, rtol=1e-5), (loss, ref)

    # Second case with B not a multiple of 8 to exercise the unpadded
    # (overrunning last block) path and the multi-tile grid.
    B2, D2 = 11, 40
    a0 = jax.random.normal(k3, (B2, D2), dtype=jnp.float32)
    a1 = jax.random.normal(k4, (B2, D2), dtype=jnp.float32)
    lab2 = jax.random.bernoulli(k5, 0.5, (B2,)).astype(jnp.int32)
    loss2 = contrastive_loss(a0, a1, lab2)
    jax.block_until_ready(loss2)
    ref2 = _reference(a0, a1, lab2)
    assert loss2.shape == (B2,)
    assert jnp.allclose(loss2, ref2, atol=1e-5, rtol=1e-5), (loss2, ref2)

    print("KERNEL_OK")
</pallas_src>

<mosaic_0001>
module attributes {stable_mosaic.version = 11 : i64} {
  func.func @_contrastive_kernel(%arg0: i32, %arg1: memref<8x32xf32, #tpu.memory_space<vmem>>, %arg2: memref<8x32xf32, #tpu.memory_space<vmem>>, %arg3: memref<8x1xf32, #tpu.memory_space<vmem>>, %arg4: memref<8x1xf32, #tpu.memory_space<vmem>>) attributes {dimension_semantics = [#tpu.dimension_semantics<parallel>], iteration_bounds = array<i64: 1>, scalar_prefetch = 0 : i64, scratch_operands = 0 : i64, tpu.core_type = #tpu.core_type<tc>, window_params = [{transform_indices = @transform_0, window_bounds = array<i64: 8, 32>}, {transform_indices = @transform_1, window_bounds = array<i64: 8, 32>}, {transform_indices = @transform_2, window_bounds = array<i64: 8, 1>}, {transform_indices = @transform_3, window_bounds = array<i64: 8, 1>}]} {
    %c0 = arith.constant 0 : index
    %c0_0 = arith.constant 0 : index
    %0 = vector.load %arg1[%c0, %c0_0] : memref<8x32xf32, #tpu.memory_space<vmem>>, vector<8x32xf32>
    %c0_1 = arith.constant 0 : index
    %c0_2 = arith.constant 0 : index
    %1 = vector.load %arg2[%c0_1, %c0_2] : memref<8x32xf32, #tpu.memory_space<vmem>>, vector<8x32xf32>
    %2 = arith.subf %0, %1 : vector<8x32xf32>
    %cst = arith.constant 9.99999997E-7 : f32
    %3 = vector.broadcast %cst : f32 to vector<8x32xf32>
    %4 = arith.addf %2, %3 : vector<8x32xf32>
    %5 = arith.mulf %4, %4 : vector<8x32xf32>
    %cst_3 = arith.constant dense<0.000000e+00> : vector<8xf32>
    %6 = vector.multi_reduction <add>, %5, %cst_3 [1] : vector<8x32xf32> to vector<8xf32>
    %7 = vector.shape_cast %6 : vector<8xf32> to vector<8x1xf32>
    %8 = math.sqrt %7 : vector<8x1xf32>
    %c0_4 = arith.constant 0 : index
    %c0_5 = arith.constant 0 : index
    %9 = vector.load %arg3[%c0_4, %c0_5] : memref<8x1xf32, #tpu.memory_space<vmem>>, vector<8x1xf32>
    %cst_6 = arith.constant 5.000000e-01 : f32
    %10 = vector.broadcast %cst_6 : f32 to vector<8x1xf32>
    %11 = arith.mulf %9, %10 : vector<8x1xf32>
    %12 = arith.mulf %8, %8 : vector<8x1xf32>
    %13 = arith.mulf %11, %12 : vector<8x1xf32>
    %cst_7 = arith.constant 1.000000e+00 : f32
    %14 = vector.broadcast %cst_7 : f32 to vector<8x1xf32>
    %15 = arith.subf %14, %9 : vector<8x1xf32>
    %cst_8 = arith.constant 5.000000e-01 : f32
    %16 = vector.broadcast %cst_8 : f32 to vector<8x1xf32>
    %17 = arith.mulf %15, %16 : vector<8x1xf32>
    %cst_9 = arith.constant 5.000000e-01 : f32
    %18 = vector.broadcast %cst_9 : f32 to vector<8x1xf32>
    %19 = arith.subf %18, %8 : vector<8x1xf32>
    %cst_10 = arith.constant 0.000000e+00 : f32
    %20 = vector.broadcast %cst_10 : f32 to vector<8x1xf32>
    %21 = arith.maximumf %19, %20 : vector<8x1xf32>
    %22 = arith.mulf %21, %21 : vector<8x1xf32>
    %23 = arith.mulf %17, %22 : vector<8x1xf32>
    %24 = arith.addf %13, %23 : vector<8x1xf32>
    %c0_11 = arith.constant 0 : index
    %c0_12 = arith.constant 0 : index
    %25 = vector.load %arg4[%c0_11, %c0_12] : memref<8x1xf32, #tpu.memory_space<vmem>>, vector<8x1xf32>
    tpu.vector_store %arg4[%c0_11, %c0_12], %24 {strides = array<i32>} : memref<8x1xf32, #tpu.memory_space<vmem>>, vector<8x1xf32>,
    return
  }
  func.func @transform_0(%arg0: i32) -> (i32, i32) {
    %c0_i32 = arith.constant 0 : i32
    %c0_i32_0 = arith.constant 0 : i32
    return %arg0, %c0_i32 : i32, i32
  }
  func.func @transform_1(%arg0: i32) -> (i32, i32) {
    %c0_i32 = arith.constant 0 : i32
    %c0_i32_0 = arith.constant 0 : i32
    return %arg0, %c0_i32 : i32, i32
  }
  func.func @transform_2(%arg0: i32) -> (i32, i32) {
    %c0_i32 = arith.constant 0 : i32
    %c0_i32_0 = arith.constant 0 : i32
    return %arg0, %c0_i32 : i32, i32
  }
  func.func @transform_3(%arg0: i32) -> (i32, i32) {
    %c0_i32 = arith.constant 0 : i32
    %c0_i32_0 = arith.constant 0 : i32
    return %arg0, %c0_i32 : i32, i32
  }
}

</mosaic_0001>

<bundles_post_ra>
// kernel: contrastive_loss.1
= control target key start
LH: loop header
LB: loop body
LE: loop exit
PB: predicated region body
PF: predicated region fallthrough
CT: control target
= control target key end

     0   :  { %vm19_vm0 = vcmask 261120   ;;  %vm41_vm3 = vcmask 7168   ;;  %s81_s0 = inlined_call_operand.vmem [shape: f32[8,32], index: 0, kind: input, shape index: {}]   ;;  %s82_s1 = inlined_call_operand.vmem [shape: f32[8,32], index: 1, kind: input, shape index: {}]   ;;  %s83_s2 = inlined_call_operand.vmem [shape: f32[8,1], index: 2, kind: input, shape index: {}]   ;;  %s84_s3 = inlined_call_operand.vmem [shape: f32[8,1], index: 3, kind: output, shape index: {}]  }
   0x1   :  { %v14_v0 = vld [vmem:[%s81_s0] sm:$0xff] }
   0x2   :  { %v15_v1 = vld [vmem:[%s82_s1] sm:$0xff] }
   0x3   :  { %v16_v2 = vsub.f32 %v14_v0, %v15_v1  ;;  %v30_v10 = vld [vmem:[%s83_s2] sm:$0xff] }
   0x4   :  { %v34_v12 = vsub.f32 1.0, %v30_v10  ;;  %v31_v15 = vmul.f32 0.5, %v30_v10 }
   0x5   :  { %v17_v3 = vadd.f32 1e-06, %v16_v2 }
   0x6   :  { %v35_v17 = vmul.f32 0.5, %v34_v12 }
   0x7   :  { %v18_v4 = vmul.f32 %v17_v3, %v17_v3 }
   0x9   :  { %v20_v5 = vsel %vm19_vm0, %v18_v4, 0.0 }
   0xa   :  { %21 = vadd.xlane.f32.xlu0 %v20_v5 }
  0x97   :  { %v22_v6 = vpop.xlane.xlu0 %21 }
  0x98   :  { %47 = vrsqrt.f32 %v22_v6  ;;  %vm25_vm1 = vcmp.eq.f32.partialorder %v22_v6, inf  ;;  %v28_v9 = vand.u32 2147483648, %v22_v6  ;;  %vm27_vm2 = vcmp.eq.f32.partialorder %v22_v6, 0.0 }
  0xa2   :  { %v48_v7 = vpop.eup %47 }
  0xa3   :  { %v24_v8 = vmul.f32 %v48_v7, %v22_v6 }
  0xa5   :  { %v26_v11 = vsel %vm25_vm1, %v22_v6, %v24_v8 }
  0xa6   :  { %v29_v13 = vsel %vm27_vm2, %v28_v9, %v26_v11 }
  0xa7   :  { %v36_v14 = vsub.f32 0.5, %v29_v13  ;;  %v32_v16 = vmul.f32 %v29_v13, %v29_v13 }
  0xa9   :  { %v37_v18 = vmax.f32 %v36_v14, 0.0  ;;  %v33_v20 = vmul.f32 %v32_v16, %v31_v15 }
  0xab   :  { %v38_v19 = vmul.f32 %v37_v18, %v37_v18 }
  0xad   :  { %v39_v21 = vmul.f32 %v38_v19, %v35_v17 }
  0xaf   :  { %v40_v22 = vadd.f32 %v39_v21, %v33_v20 }
  0xb1   :  { %42 = vst.msk [vmem:[%s84_s3] sm:$0xff] %vm41_vm3, %v40_v22 }

</bundles_post_ra>
